<compile_context>
chip_gen: v7x
topology: tpu7x:2x2x1
jax: 0.10.0
libtpu: 0.0.40
codegen_flags: <defaults>
</compile_context>

<pallas_src>
import functools

import jax
import jax.numpy as jnp
from jax.experimental import pallas as pl
from jax.experimental.pallas import tpu as pltpu

LANE = 128
SUBLANE = 8


def _round_up(x, m):
    return ((x + m - 1) // m) * m


def _vmem_capacity_bytes():
    try:
        info = pltpu.get_tpu_info()
        cap = int(getattr(info, "vmem_capacity_bytes", 0) or 0)
        if cap > 0:
            return cap
    except Exception:
        pass
    return 64 * 2**20  # conservative fallback (v7x-sized VMEM)


def _loss_partials_kernel(fake_ref, mask_ref, img_ref, out_ref, *,
                          rows, n_half, valid_rows):
    s = pl.program_id(2)

    @pl.when(s == 0)
    def _init():
        out_ref[...] = jnp.zeros_like(out_ref)

    # Global spatial block this step is responsible for.  The index_map clamps
    # the DMA'd block start in-bounds; `valid` masks any rows that do not
    # belong to this step (partial tail block / clamped out-of-range step).
    step = pl.program_id(0) * n_half + s
    valid = valid_rows - step * rows            # may be <= 0 for clamped steps

    f = fake_ref[...]                           # (1, C, rows, LANE)
    x = img_ref[...]                            # (1, C, rows, LANE)
    m = mask_ref[...]                           # (1, 1, rows, LANE) -> bcast over C

    # |(f - x) * m| == |f*m - x*m|; elementwise in input dtype, f32 accumulate.
    d = jnp.abs((f - x) * m).astype(jnp.float32)

    @pl.when(valid >= rows)                     # common case: fully valid block
    def _full():
        out_ref[...] += d.reshape(-1, SUBLANE, LANE).sum(axis=0).reshape(out_ref.shape)

    @pl.when(valid < rows)                      # ragged tail: select garbage -> 0
    def _tail():
        rid = jax.lax.broadcasted_iota(jnp.int32, d.shape, 2)
        dm = jnp.where(rid < valid, d, 0.0)
        out_ref[...] += dm.reshape(-1, SUBLANE, LANE).sum(axis=0).reshape(out_ref.shape)


def rgb_background_l1_loss(fake, input_semantics, image_tag):
    """fake: [B,C,H,W], input_semantics: [B,Cs,H,W] (channel 0 = background),
    image_tag: [B,C,H,W].  Returns mean(|fake*mask - image_tag*mask|)."""
    B, C, H, W = fake.shape
    HW = H * W
    total_n = float(B * C * HW)

    itemsize = jnp.dtype(fake.dtype).itemsize
    mask_itemsize = jnp.dtype(input_semantics.dtype).itemsize
    row_align = SUBLANE * max(1, 4 // itemsize)   # 8 f32, 16 bf16, 32 int8/fp8

    # Spatial rows of 128 lanes.  Pad only when H*W is not lane-aligned or the
    # image is smaller than one aligned tile (pads are zero -> contribute 0).
    R = max(pl.cdiv(HW, LANE), row_align)
    HW_pad = R * LANE
    if HW_pad != HW:
        pad = ((0, 0), (0, 0), (0, HW_pad - HW))
        fake_t = jnp.pad(fake.reshape(B, C, HW), pad).reshape(B, C, R, LANE)
        img_t = jnp.pad(image_tag.reshape(B, C, HW), pad).reshape(B, C, R, LANE)
        mask_t = jnp.pad(input_semantics[:, :1, :, :].reshape(B, 1, HW),
                         pad).reshape(B, 1, R, LANE)
    else:
        # Free reshapes (trailing-dim split); channel 0 of input_semantics is
        # selected by the BlockSpec index_map -> no slice/copy pass in HBM.
        Cs = input_semantics.shape[1]
        fake_t = fake.reshape(B, C, R, LANE)
        img_t = image_tag.reshape(B, C, R, LANE)
        mask_t = input_semantics.reshape(B, Cs, R, LANE)

    # ---- tile geometry: dtype- and chip-aware --------------------------------
    vmem_cap = _vmem_capacity_bytes()
    vmem_budget = max(8 * 2**20, min(28 * 2**20, vmem_cap // 2 - 4 * 2**20))
    vmem_limit = int(max(16 * 2**20,
                         min(vmem_cap - 8 * 2**20, vmem_budget + 16 * 2**20)))

    # Double-buffered input bytes per row-of-128-lanes + allowance for f32 temps.
    bytes_per_row = (2 * C + 1) * LANE * itemsize * 2 + 4 * C * LANE * 4
    rows_aligned_max = (R // row_align) * row_align
    # NOTE: for pathologically large C this falls back to the minimum aligned
    # tile (row_align rows); the explicit vmem_limit keeps headroom for that.
    rows_cap = max(row_align,
                   min(rows_aligned_max,
                       (vmem_budget // bytes_per_row) // row_align * row_align))
    # Aim for >= 2 spatial steps: pipeline overlap + both v7x TensorCores busy.
    n_pre = pl.cdiv(R, rows_cap)
    if R >= 2 * row_align:
        n_pre = max(n_pre, 2)
    rows = min(_round_up(pl.cdiv(R, n_pre), row_align), rows_aligned_max)
    n_spatial = pl.cdiv(R, rows)                 # every block start is in-bounds
    n_split = 2 if n_spatial >= 2 else 1         # leading parallel (2-TC) axis
    n_half = pl.cdiv(n_spatial, n_split)
    last_block = n_spatial - 1

    def data_idx(h, b, s):
        # Clamp so the DMA'd block always starts in-bounds; the kernel masks
        # rows that do not belong to this step.
        return (b, 0, jnp.minimum(h * n_half + s, last_block), 0)

    kernel = functools.partial(_loss_partials_kernel,
                               rows=rows, n_half=n_half, valid_rows=R)

    partials = pl.pallas_call(
        kernel,
        out_shape=jax.ShapeDtypeStruct((n_split, B, SUBLANE, LANE), jnp.float32),
        grid_spec=pltpu.PrefetchScalarGridSpec(
            num_scalar_prefetch=0,
            grid=(n_split, B, n_half),
            in_specs=[
                pl.BlockSpec((1, C, rows, LANE), data_idx),   # fake
                pl.BlockSpec((1, 1, rows, LANE), data_idx),   # background mask (ch 0)
                pl.BlockSpec((1, C, rows, LANE), data_idx),   # image_tag
            ],
            out_specs=pl.BlockSpec((1, 1, SUBLANE, LANE),
                                   lambda h, b, s: (h, b, 0, 0)),
        ),
        compiler_params=pltpu.CompilerParams(
            dimension_semantics=("parallel", "parallel", "arbitrary"),
            vmem_limit_bytes=vmem_limit,
        ),
        cost_estimate=pl.CostEstimate(
            flops=5 * B * C * HW,
            transcendentals=0,
            bytes_accessed=int(B * HW * (2 * C * itemsize + mask_itemsize)
                               + n_split * B * SUBLANE * LANE * 4),
        ),
    )(fake_t, mask_t, img_t)

    # Single cross-lane reduction + mean normalization (padded / masked
    # elements contributed exactly 0, so divide by the true element count).
    return jnp.sum(partials) * (1.0 / total_n)


def _reference(fake, input_semantics, image_tag):
    mask = input_semantics[:, 0:1, :, :]
    return jnp.mean(jnp.abs(fake * mask - image_tag * mask))


if __name__ == "__main__":
    key = jax.random.PRNGKey(0)

    # (B, C, Cs, H, W): exercise tiny-pad path, the unpadded/full-semantics
    # path, and the lane-pad + ragged-tail + 2-way-split path (B=1).
    cases = [(2, 3, 4, 16, 16),
             (2, 3, 4, 32, 32),
             (1, 3, 4, 40, 40)]

    for (B, C, Cs, H, W) in cases:
        key, k1, k2, k3 = jax.random.split(key, 4)
        fake = jax.random.normal(k1, (B, C, H, W), dtype=jnp.float32)
        image_tag = jax.random.normal(k2, (B, C, H, W), dtype=jnp.float32)
        # synthetic semantics: channel 0 is a soft background mask in [0, 1]
        input_semantics = jax.random.uniform(k3, (B, Cs, H, W), dtype=jnp.float32)

        loss = rgb_background_l1_loss(fake, input_semantics, image_tag)
        jax.block_until_ready(loss)

        ref = _reference(fake, input_semantics, image_tag)
        assert jnp.allclose(loss, ref, rtol=1e-5, atol=1e-6), (B, C, H, W, loss, ref)

    print("KERNEL_OK")
</pallas_src>

<mosaic_0001>
module attributes {stable_mosaic.version = 11 : i64} {
  func.func @_loss_partials_kernel(%arg0: i32, %arg1: i32, %arg2: i32, %arg3: memref<1x3x8x128xf32, #tpu.memory_space<vmem>>, %arg4: memref<1x1x8x128xf32, #tpu.memory_space<vmem>>, %arg5: memref<1x3x8x128xf32, #tpu.memory_space<vmem>>, %arg6: memref<1x1x8x128xf32, #tpu.memory_space<vmem>>) attributes {dimension_semantics = [#tpu.dimension_semantics<parallel>, #tpu.dimension_semantics<parallel>, #tpu.dimension_semantics<arbitrary>], iteration_bounds = array<i64: 1, 2, 1>, scalar_prefetch = 0 : i64, scratch_operands = 0 : i64, tpu.core_type = #tpu.core_type<tc>, window_params = [{transform_indices = @transform_0, window_bounds = array<i64: 1, 3, 8, 128>}, {transform_indices = @transform_1, window_bounds = array<i64: 1, 1, 8, 128>}, {transform_indices = @transform_2, window_bounds = array<i64: 1, 3, 8, 128>}, {transform_indices = @transform_3, window_bounds = array<i64: 1, 1, 8, 128>}]} {
    %c0_i32 = arith.constant 0 : i32
    %0 = arith.cmpi eq, %arg2, %c0_i32 : i32
    %1 = arith.extui %0 : i1 to i32
    %c0_i32_0 = arith.constant 0 : i32
    %2 = arith.cmpi ne, %1, %c0_i32_0 : i32
    scf.if %2 {
      %cst = arith.constant 0.000000e+00 : f32
      %20 = vector.broadcast %cst : f32 to vector<1x1x8x128xf32>
      %c0_17 = arith.constant 0 : index
      %c0_18 = arith.constant 0 : index
      %c0_19 = arith.constant 0 : index
      %c0_20 = arith.constant 0 : index
      %21 = vector.load %arg6[%c0_17, %c0_18, %c0_19, %c0_20] : memref<1x1x8x128xf32, #tpu.memory_space<vmem>>, vector<1x1x8x128xf32>
      tpu.vector_store %arg6[%c0_17, %c0_18, %c0_19, %c0_20], %20 {strides = array<i32>} : memref<1x1x8x128xf32, #tpu.memory_space<vmem>>, vector<1x1x8x128xf32>,
    } else {
    }
    %c1_i32 = arith.constant 1 : i32
    %3 = arith.muli %arg0, %c1_i32 : i32
    %4 = arith.addi %3, %arg2 : i32
    %c8_i32 = arith.constant 8 : i32
    %5 = arith.muli %4, %c8_i32 : i32
    %c8_i32_1 = arith.constant 8 : i32
    %6 = arith.subi %c8_i32_1, %5 : i32
    %c0 = arith.constant 0 : index
    %c0_2 = arith.constant 0 : index
    %c0_3 = arith.constant 0 : index
    %c0_4 = arith.constant 0 : index
    %7 = vector.load %arg3[%c0, %c0_2, %c0_3, %c0_4] : memref<1x3x8x128xf32, #tpu.memory_space<vmem>>, vector<1x3x8x128xf32>
    %c0_5 = arith.constant 0 : index
    %c0_6 = arith.constant 0 : index
    %c0_7 = arith.constant 0 : index
    %c0_8 = arith.constant 0 : index
    %8 = vector.load %arg5[%c0_5, %c0_6, %c0_7, %c0_8] : memref<1x3x8x128xf32, #tpu.memory_space<vmem>>, vector<1x3x8x128xf32>
    %c0_9 = arith.constant 0 : index
    %c0_10 = arith.constant 0 : index
    %c0_11 = arith.constant 0 : index
    %c0_12 = arith.constant 0 : index
    %9 = vector.load %arg4[%c0_9, %c0_10, %c0_11, %c0_12] : memref<1x1x8x128xf32, #tpu.memory_space<vmem>>, vector<1x1x8x128xf32>
    %10 = arith.subf %7, %8 : vector<1x3x8x128xf32>
    %11 = vector.broadcast %9 : vector<1x1x8x128xf32> to vector<1x3x8x128xf32>
    %12 = arith.mulf %10, %11 : vector<1x3x8x128xf32>
    %13 = math.absf %12 : vector<1x3x8x128xf32>
    %c8_i32_13 = arith.constant 8 : i32
    %14 = arith.cmpi sge, %6, %c8_i32_13 : i32
    %15 = arith.extui %14 : i1 to i32
    %c0_i32_14 = arith.constant 0 : i32
    %16 = arith.cmpi ne, %15, %c0_i32_14 : i32
    scf.if %16 {
      %c0_17 = arith.constant 0 : index
      %c0_18 = arith.constant 0 : index
      %c0_19 = arith.constant 0 : index
      %c0_20 = arith.constant 0 : index
      %20 = vector.load %arg6[%c0_17, %c0_18, %c0_19, %c0_20] : memref<1x1x8x128xf32, #tpu.memory_space<vmem>>, vector<1x1x8x128xf32>
      %21 = vector.shape_cast %13 : vector<1x3x8x128xf32> to vector<3x8x128xf32>
      %cst = arith.constant dense<0.000000e+00> : vector<8x128xf32>
      %22 = vector.multi_reduction <add>, %21, %cst [0] : vector<3x8x128xf32> to vector<8x128xf32>
      %23 = vector.shape_cast %22 : vector<8x128xf32> to vector<1x1x8x128xf32>
      %24 = arith.addf %20, %23 : vector<1x1x8x128xf32>
      %c0_21 = arith.constant 0 : index
      %c0_22 = arith.constant 0 : index
      %c0_23 = arith.constant 0 : index
      %c0_24 = arith.constant 0 : index
      %25 = vector.load %arg6[%c0_21, %c0_22, %c0_23, %c0_24] : memref<1x1x8x128xf32, #tpu.memory_space<vmem>>, vector<1x1x8x128xf32>
      tpu.vector_store %arg6[%c0_21, %c0_22, %c0_23, %c0_24], %24 {strides = array<i32>} : memref<1x1x8x128xf32, #tpu.memory_space<vmem>>, vector<1x1x8x128xf32>,
    } else {
    }
    %c8_i32_15 = arith.constant 8 : i32
    %17 = arith.cmpi slt, %6, %c8_i32_15 : i32
    %18 = arith.extui %17 : i1 to i32
    %c0_i32_16 = arith.constant 0 : i32
    %19 = arith.cmpi ne, %18, %c0_i32_16 : i32
    scf.if %19 {
      %20 = tpu.iota {dimensions = array<i32: 2>} : vector<1x3x8x128xi32>
      %21 = vector.broadcast %6 : i32 to vector<1x3x8x128xi32>
      %22 = arith.cmpi slt, %20, %21 : vector<1x3x8x128xi32>
      %cst = arith.constant 0.000000e+00 : f32
      %23 = vector.broadcast %cst : f32 to vector<1x3x8x128xf32>
      %24 = arith.select %22, %13, %23 : vector<1x3x8x128xi1>, vector<1x3x8x128xf32>
      %c0_17 = arith.constant 0 : index
      %c0_18 = arith.constant 0 : index
      %c0_19 = arith.constant 0 : index
      %c0_20 = arith.constant 0 : index
      %25 = vector.load %arg6[%c0_17, %c0_18, %c0_19, %c0_20] : memref<1x1x8x128xf32, #tpu.memory_space<vmem>>, vector<1x1x8x128xf32>
      %26 = vector.shape_cast %24 : vector<1x3x8x128xf32> to vector<3x8x128xf32>
      %cst_21 = arith.constant dense<0.000000e+00> : vector<8x128xf32>
      %27 = vector.multi_reduction <add>, %26, %cst_21 [0] : vector<3x8x128xf32> to vector<8x128xf32>
      %28 = vector.shape_cast %27 : vector<8x128xf32> to vector<1x1x8x128xf32>
      %29 = arith.addf %25, %28 : vector<1x1x8x128xf32>
      %c0_22 = arith.constant 0 : index
      %c0_23 = arith.constant 0 : index
      %c0_24 = arith.constant 0 : index
      %c0_25 = arith.constant 0 : index
      %30 = vector.load %arg6[%c0_22, %c0_23, %c0_24, %c0_25] : memref<1x1x8x128xf32, #tpu.memory_space<vmem>>, vector<1x1x8x128xf32>
      tpu.vector_store %arg6[%c0_22, %c0_23, %c0_24, %c0_25], %29 {strides = array<i32>} : memref<1x1x8x128xf32, #tpu.memory_space<vmem>>, vector<1x1x8x128xf32>,
    } else {
    }
    return
  }
  func.func @transform_0(%arg0: i32, %arg1: i32, %arg2: i32) -> (i32, i32, i32, i32) {
    %c1_i32 = arith.constant 1 : i32
    %0 = arith.muli %arg0, %c1_i32 : i32
    %1 = arith.addi %0, %arg2 : i32
    %c0_i32 = arith.constant 0 : i32
    %2 = arith.minsi %1, %c0_i32 : i32
    %c0_i32_0 = arith.constant 0 : i32
    %c0_i32_1 = arith.constant 0 : i32
    %c0_i32_2 = arith.constant 0 : i32
    return %arg1, %c0_i32_0, %2, %c0_i32_1 : i32, i32, i32, i32
  }
  func.func @transform_1(%arg0: i32, %arg1: i32, %arg2: i32) -> (i32, i32, i32, i32) {
    %c1_i32 = arith.constant 1 : i32
    %0 = arith.muli %arg0, %c1_i32 : i32
    %1 = arith.addi %0, %arg2 : i32
    %c0_i32 = arith.constant 0 : i32
    %2 = arith.minsi %1, %c0_i32 : i32
    %c0_i32_0 = arith.constant 0 : i32
    %c0_i32_1 = arith.constant 0 : i32
    %c0_i32_2 = arith.constant 0 : i32
    return %arg1, %c0_i32_0, %2, %c0_i32_1 : i32, i32, i32, i32
  }
  func.func @transform_2(%arg0: i32, %arg1: i32, %arg2: i32) -> (i32, i32, i32, i32) {
    %c1_i32 = arith.constant 1 : i32
    %0 = arith.muli %arg0, %c1_i32 : i32
    %1 = arith.addi %0, %arg2 : i32
    %c0_i32 = arith.constant 0 : i32
    %2 = arith.minsi %1, %c0_i32 : i32
    %c0_i32_0 = arith.constant 0 : i32
    %c0_i32_1 = arith.constant 0 : i32
    %c0_i32_2 = arith.constant 0 : i32
    return %arg1, %c0_i32_0, %2, %c0_i32_1 : i32, i32, i32, i32
  }
  func.func @transform_3(%arg0: i32, %arg1: i32, %arg2: i32) -> (i32, i32, i32, i32) {
    %c0_i32 = arith.constant 0 : i32
    %c0_i32_0 = arith.constant 0 : i32
    %c0_i32_1 = arith.constant 0 : i32
    return %arg0, %arg1, %c0_i32, %c0_i32_0 : i32, i32, i32, i32
  }
}

</mosaic_0001>

<bundles_post_ra>
// kernel: tpu_custom_call.1
= control target key start
LH: loop header
LB: loop body
LE: loop exit
PB: predicated region body
PF: predicated region fallthrough
CT: control target
= control target key end

     0   :  { %s1089_s0 = inlined_call_operand.hbm [shape: f32[2,3,8,128], index: 0, kind: input, shape index: {}]   ;;  %s1090_s1 = inlined_call_operand.hbm [shape: f32[2,1,8,128], index: 1, kind: input, shape index: {}]   ;;  %s1091_s2 = inlined_call_operand.hbm [shape: f32[2,3,8,128], index: 2, kind: input, shape index: {}]   ;;  %s1092_s3 = inlined_call_operand.hbm [shape: f32[1,2,8,128], index: 3, kind: output, shape index: {}]  }
   0x1   :  { %1097 = sst [smem:[#allocation15_spill]] %s1090_s1 }
   0x2   :  { %8 = vsyncpa [#allocation3], 0 }
   0x3   :  { %10 = vsyncpa [#allocation3 + $0x1], 0 }
   0x4   :  { %11 = vsyncpa [#allocation6], 0 }
   0x5   :  { %13 = vsyncpa [#allocation6 + $0x1], 0 }
   0x6   :  { %14 = vsyncpa [#allocation4], 0 }
   0x7   :  { %16 = vsyncpa [#allocation4 + $0x1], 0  ;;  %s824_s12 = smov 0   ;;  %s826_s13 = smov 0  }
   0x8   :  { %s828_s14 = smov 0   ;;  %s830_s15 = smov 0  }
   0x9   :  { %s832_s16 = smov 0   ;;  %s834_s17 = smov 0  }
   0xa LB: > { %1098 = sst [smem:[#allocation12_spill]] %s792_s16  ;;  %s855_s18 = sadd.s32 4294967295, %s796_s17   ;;  %s796_s17 = sphi %s834_s17, %s22_s17   ;;  %s792_s16 = sphi %s832_s16, %s1116_s16   ;;  %s788_s15 = sphi %s830_s15, %s1115_s15   ;;  %s784_s14 = sphi %s828_s14, %s1119_s14   ;;  %s780_s13 = sphi %s826_s13, %s1118_s13   ;;  %s776_s12 = sphi %s824_s12, %s1117_s12  }
   0xb   : > { %s526_s19 = sadd.s32 4294967294, %s796_s17   ;;  %s37_s20 = sadd.s32 1, %s792_s16 }
   0xc   : > { %s56_s21 = sadd.s32 1, %s784_s14  ;;  %p39_p0 = scmp.ge.s32.totalorder %s37_s20, 2 }
   0xd   : > { %p63_p1 = scmp.ne.s32.totalorder %s784_s14, %s780_s13  ;;  %p64_p2 = scmp.eq.s32.totalorder %s796_s17, 0 }
   0xe   : > { %p69_p3 = scmp.ne.s32.totalorder %s780_s13, %s776_s12  ;;  %s1121_s20 = smov (%p39_p0, %s37_s20), 0 }
   0xf   : > { %1099 = sst [smem:[#allocation13_spill]] %s1121_s20  ;;  %p867_p4 = por %p64_p2, %p63_p1 }
  0x10   : > { %p70_p5 = scmp.eq.s32.totalorder %s855_s18, 0  ;;  %s51_s23 = ssub.s32 %s792_s16, %s1121_s20 }
  0x11   : > { %p163_p6 = scmp.eq.s32.totalorder %s855_s18, 1  ;;  %p54_p7 = scmp.eq.s32.totalorder %s51_s23, 0 }
  0x12   : > { %p875_p8 = por %p70_p5, %p69_p3  ;;  %p169_p10 = scmp.eq.s32.totalorder %s526_s19, 1 }
  0x13   : > { %p879_p9 = por %p163_p6, %p63_p1  ;;  %p567_p13 = scmp.lt.s32.totalorder %s796_s17, 2 }
  0x14   : > { %s1101_s24 = scalar_select %p875_p8, 1, 0 }
  0x15   : > { %s1102_s25 = scalar_select %p879_p9, 1, 0 }
  0x16   : > { %s884_s26 = scalar_select %p54_p7, %s784_s14, %s56_s21  }
  0x17   : > { %p886_p11 = por %p169_p10, %p69_p3  ;;  %s893_s28 = sand.u32 1, %s784_s14  }
  0x18   : > { %1103 = sst [smem:[#allocation14_spill]] %s884_s26  ;;  %s540_s29 = smul.u32 24, %s893_s28 }
  0x19   : > { %s1104_s27 = scalar_select %p886_p11, 1, 0 }
  0x1a   : > { %s214_s30 = sand.u32 1, %s796_s17   ;;  %p899_p0 = pnand %p567_p13, %p867_p4 }
  0x1b   : > { %s530_s5 = sshll.u32 %s893_s28, 3  ;;  %s531_s6 = sshll.u32 %s792_s16, 7 }
  0x1c   : > { %s1106_s1 = sld [smem:[#allocation15_spill]]  ;;  %s218_s10 = scalar_lea.vmem [#allocation5], %s530_s5 }
  0x1d   : > { %s229_s11 = sshll.u32 %s218_s10, 4  ;;  %s912_s19 = scalar_lea.sflag [#allocation6], %s214_s30  ;;  %s910_s11 = int_to_ptr.vmem [resolvable:$true] %s229_s11 }
  0x1e   : > { %p918_p2 = pneg %p899_p0 }
  0x22   : > { %s908_s9 = scalar_lea.hbm %s1106_s1, %s531_s6  ;;  %s625_s5 = scalar_lea.hbm %s1106_s1, 256 }
  0x23   : > { %s620_s21 = scalar_lea.hbm %s908_s9, 128  ;;  %p626_p5 = scmp.lt.u32.totalorder %s908_s9, %s1106_s1 }
  0x24   : > { %p621_p1 = scmp.ne.s32.totalorder %s908_s9, %s620_s21  ;;  %p627_p6 = scmp.lt.u32.totalorder %s625_s5, %s620_s21 }
  0x25   : > { %p629_p10 = scmp.lt.u32.totalorder %s620_s21, %s908_s9 }
  0x26   : > { %p623_p3 = pnand %p918_p2, %p621_p1  ;;  %p628_p7 = por %p627_p6, %p626_p5 }
  0x28   : > { %p624_p4 = pneg %p623_p3  ;;  %p630_p13 = por %p629_p10, %p628_p7 }
  0x2a   : > { %p631_p12 = pnand %p630_p13, %p624_p4 }
  0x2c   : > { %634 = shalt.err (!%p631_p12)
}
  0x2d   : > { %s635_s30 = scalar_lea.vmem %s910_s11, 128  ;;  %s798_s10 = smov [#allocation5]  }
  0x2e   : > { %p636_p1 = scmp.ne.s32.totalorder %s910_s11, %s635_s30  ;;  %s640_s23 = sshll.u32 %s798_s10, 4  ;;  %s641_s23 = int_to_ptr.vmem [resolvable:$false] %s640_s23 }
  0x2f   : > { %s642_s6 = scalar_lea.vmem %s641_s23, 256  ;;  %p643_p9 = scmp.lt.s32.totalorder %s910_s11, %s641_s23 }
  0x30   : > { %p638_p3 = pnand %p636_p1, %p918_p2  ;;  %p644_p8 = scmp.lt.s32.totalorder %s642_s6, %s635_s30 }
  0x32   : > { %p639_p11 = pneg %p638_p3  ;;  %p645_p5 = por %p644_p8, %p643_p9 }
  0x34   : > { %p646_p6 = pnand %p645_p5, %p639_p11 }
  0x36   : > { %649 = shalt.err (!%p646_p6)
}
  0x37   : > { %559 = dma.hbm_to_vmem [thread:$0]  (!%p899_p0), %s908_s9, 128, %s910_s11, %s912_s19  }
  0x38   : > { %s240_s21 = scalar_lea.vmem [#allocation7], %s540_s29  ;;  %p533_p12 = scmp.ge.s32.totalorder %s796_s17, 1 }
  0x39   : > { %s251_s5 = sshll.u32 %s240_s21, 4  ;;  %p259_p8 = scmp.lt.s32.totalorder %s796_s17, 3  ;;  %s945_s5 = int_to_ptr.vmem [resolvable:$true] %s251_s5 }
  0x3a   : > { %s541_s8 = smul.u32 384, %s792_s16  ;;  %s193_s30 = scalar_lea.vmem [#allocation2], %s540_s29 }
  0x3b   : > { %p948_p9 = pnand %p533_p12, %p259_p8  ;;  %s204_s10 = sshll.u32 %s193_s30, 4  ;;  %s960_s10 = int_to_ptr.vmem [resolvable:$true] %s204_s10 }
  0x3c   : > { %s958_s9 = scalar_lea.hbm %s1089_s0, %s541_s8  ;;  %s965_s1 = scalar_lea.hbm %s1091_s2, %s541_s8 }
  0x3d   : > { %s1108_s7 = scalar_select %p948_p9, 1, 0 }
  0x3e   : > { %s190_s20 = scalar_lea.sflag [#allocation3], %s893_s28  ;;  %s650_s16 = scalar_lea.hbm %s958_s9, 384 }
  0x3f   : > { %p651_p11 = scmp.ne.s32.totalorder %s958_s9, %s650_s16  ;;  %s655_s23 = scalar_lea.hbm %s1089_s0, 768 }
  0x40   : > { %p656_p10 = scmp.lt.u32.totalorder %s958_s9, %s1089_s0  ;;  %p657_p13 = scmp.lt.u32.totalorder %s655_s23, %s650_s16 }
  0x41   : > { %p653_p4 = pnand %p651_p11, %p918_p2  ;;  %p659_p3 = scmp.lt.u32.totalorder %s650_s16, %s958_s9 }
  0x42   : > { %p658_p1 = por %p657_p13, %p656_p10 }
  0x43   : > { %p654_p7 = pneg %p653_p4 }
  0x44   : > { %p660_p5 = por %p659_p3, %p658_p1 }
  0x46   : > { %p661_p6 = pnand %p660_p5, %p654_p7 }
  0x48   : > { %664 = shalt.err (!%p661_p6)
}
  0x49   : > { %s665_s8 = scalar_lea.vmem %s960_s10, 384  ;;  %s799_s11 = smov [#allocation2]  }
  0x4a   : > { %p666_p12 = scmp.ne.s32.totalorder %s960_s10, %s665_s8  ;;  %s670_s21 = sshll.u32 %s799_s11, 4  ;;  %s671_s21 = int_to_ptr.vmem [resolvable:$false] %s670_s21 }
  0x4b   : > { %s672_s26 = scalar_lea.vmem %s671_s21, 768  ;;  %p673_p4 = scmp.lt.s32.totalorder %s960_s10, %s671_s21 }
  0x4c   : > { %p668_p8 = pnand %p666_p12, %p918_p2  ;;  %p674_p9 = scmp.lt.s32.totalorder %s672_s26, %s665_s8 }
  0x4e   : > { %p669_p11 = pneg %p668_p8  ;;  %p675_p10 = por %p674_p9, %p673_p4 }
  0x50   : > { %p676_p13 = pnand %p675_p10, %p669_p11 }
  0x52   : > { %679 = shalt.err (!%p676_p13)
}
  0x53   : > { %s800_s16 = smov 128   ;;  %s801_s29 = smov 8  }
  0x54   : > { %556 = dma.hbm_to_vmem [thread:$0]  (!%p899_p0), %s958_s9, 384, %s960_s10, %s190_s20, %s800_s16, %s800_s16, %s801_s29  }
  0x55   : > { %s680_s30 = scalar_lea.hbm %s965_s1, 384  ;;  %s685_s8 = scalar_lea.hbm %s1091_s2, 768 }
  0x56   : > { %p681_p9 = scmp.ne.s32.totalorder %s965_s1, %s680_s30  ;;  %p686_p3 = scmp.lt.u32.totalorder %s965_s1, %s1091_s2 }
  0x57   : > { %p687_p5 = scmp.lt.u32.totalorder %s685_s8, %s680_s30  ;;  %p689_p12 = scmp.lt.u32.totalorder %s680_s30, %s965_s1 }
  0x58   : > { %p683_p7 = pnand %p681_p9, %p918_p2 }
  0x59   : > { %p688_p6 = por %p687_p5, %p686_p3 }
  0x5a   : > { %p684_p1 = pneg %p683_p7 }
  0x5b   : > { %p690_p8 = por %p689_p12, %p688_p6 }
  0x5d   : > { %p691_p11 = pnand %p690_p8, %p684_p1 }
  0x5f   : > { %694 = shalt.err (!%p691_p11)
}
  0x60   : > { %s695_s20 = scalar_lea.vmem %s945_s5, 384  ;;  %s802_s28 = smov [#allocation7]  }
  0x61   : > { %p696_p4 = scmp.ne.s32.totalorder %s945_s5, %s695_s20  ;;  %s700_s10 = sshll.u32 %s802_s28, 4  ;;  %s701_s10 = int_to_ptr.vmem [resolvable:$false] %s700_s10 }
  0x62   : > { %s702_s9 = scalar_lea.vmem %s701_s10, 768  ;;  %p703_p9 = scmp.lt.s32.totalorder %s945_s5, %s701_s10 }
  0x63   : > { %p698_p10 = pnand %p696_p4, %p918_p2  ;;  %p704_p7 = scmp.lt.s32.totalorder %s702_s9, %s695_s20 }
  0x65   : > { %p699_p13 = pneg %p698_p10  ;;  %p705_p3 = por %p704_p7, %p703_p9 }
  0x67   : > { %p706_p5 = pnand %p705_p3, %p699_p13 }
  0x69   : > { %709 = shalt.err (!%p706_p5)
}
  0x6a   : > { %562 = dma.hbm_to_vmem [thread:$0]  (!%p899_p0), %s965_s1, 384, %s945_s5, %s912_s19, %s800_s16, %s800_s16, %s801_s29  }
  0x6b   : > { %p1109_p2 = scmp.ne.s32.totalorder %s1108_s7, 0 }
  0x6c   : > { %s1022_s22 = sand.u32 (!%p1109_p2), 1, %s780_s13   ;;  %p1110_p1 = scmp.ne.s32.totalorder (!%p1109_p2), %s1101_s24, 0 }
  0x6d   : > { %263 = sbr.rel (%p1109_p2) target bundleno = 146 (0x92), region = 32  ;;  %s266_s30 = scalar_lea.sflag (!%p1109_p2), [#allocation3], %s1022_s22 }
  0x6e   : > { %s544_s26 = smul.u32 (!%p1109_p2), 24, %s1022_s22 }
  0x70   : > { %s269_s23 = scalar_lea.vmem (!%p1109_p2), [#allocation2], %s544_s26 }
  0x74   : > { %763 = dma.done.wait (%p1110_p1), %s266_s30, 384  }
  0x75   : > { %765 = vsyncadd (%p1110_p1), %s266_s30, 4294966912  ;;  %s274_s1 = sand.u32 1, %s855_s18   ;;  %s534_s4 = sshll.u32 %s1022_s22, 3 }
  0x76   : > { %s275_s19 = scalar_lea.sflag [#allocation6], %s274_s1  ;;  %s278_s5 = scalar_lea.vmem [#allocation5], %s534_s4 }
  0x77   : > { %767 = dma.done.wait (%p1110_p1), %s275_s19, 512  }
  0x78   : > { %769 = vsyncadd (%p1110_p1), %s275_s19, 4294966784  ;;  %v337_v0 = vld [vmem:[%s269_s23] sm:$0xff]  ;;  %v338_v1 = vld [vmem:[%s269_s23 + $0x8] sm:$0xff]  ;;  %s287_s7 = scalar_lea.vmem [#allocation7], %s544_s26  ;;  %s537_s18 = sshll.u32 %s788_s15, 7 }
  0x79   : > { %v339_v2 = vld [vmem:[%s269_s23 + $0x10] sm:$0xff]  ;;  %v340_v3 = vld [vmem:[%s287_s7] sm:$0xff]  ;;  %v341_v4 = vld [vmem:[%s287_s7 + $0x8] sm:$0xff]  ;;  %s319_s24 = scalar_lea.vmem [#allocation8], %s534_s4  ;;  %s1040_s8 = scalar_lea.hbm %s1092_s3, %s537_s18 }
  0x7a   : > { %v342_v5 = vld [vmem:[%s287_s7 + $0x10] sm:$0xff]  ;;  %v344_v7 = vsub.f32 %v337_v0, %v340_v3  ;;  %v345_v8 = vsub.f32 %v338_v1, %v341_v4  ;;  %s394_s16 = sshll.u32 %s319_s24, 4  ;;  %s379_s11 = scalar_lea.sflag [#allocation4], %s1022_s22  ;;  %s1042_s16 = int_to_ptr.vmem [resolvable:$true] %s394_s16 }
  0x7b   : > { %v343_v6 = vld [vmem:[%s278_s5] sm:$0xff]  ;;  %v346_v9 = vsub.f32 %v339_v2, %v342_v5  ;;  %s710_s21 = scalar_lea.vmem %s1042_s16, 128  ;;  %p1111_p6 = scmp.ne.s32.totalorder %s1102_s25, 0 }
  0x7c   : > { %v347_v10 = vmul.f32 %v344_v7, %v343_v6  ;;  %v348_v11 = vmul.f32 %v345_v8, %v343_v6  ;;  %p711_p0 = scmp.ne.s32.totalorder %s1042_s16, %s710_s21  ;;  %s803_s15 = smov [#allocation8]  }
  0x7d   : > { %v349_v12 = vmul.f32 %v346_v9, %v343_v6  ;;  %s714_s20 = sshll.u32 %s803_s15, 4  ;;  %s715_s20 = int_to_ptr.vmem [resolvable:$false] %s714_s20 }
  0x7e   : > { %v350_v13 = vand.u32 2147483647, %v347_v10  ;;  %v351_v14 = vand.u32 2147483647, %v348_v11  ;;  %p712_p12 = pnand %p711_p0, %p1111_p6  ;;  %s716_s28 = scalar_lea.vmem %s715_s20, 256 }
  0x7f   : > { %v352_v15 = vand.u32 2147483647, %v349_v12  ;;  %p717_p11 = scmp.lt.s32.totalorder %s1042_s16, %s715_s20  ;;  %p718_p4 = scmp.lt.s32.totalorder %s716_s28, %s710_s21 }
  0x80   : > { %v358_v16 = vadd.f32 %v351_v14, %v350_v13  ;;  %p713_p8 = pneg %p712_p12 }
  0x81   : > { %p719_p10 = por %p718_p4, %p717_p11 }
  0x82   : > { %v359_v17 = vadd.f32 %v358_v16, %v352_v15 }
  0x83   : > { %p720_p13 = pnand %p719_p10, %p713_p8 }
  0x84   : > { %361 = vst [vmem:[%s319_s24] sm:$0xff] %v359_v17 }
  0x85   : > { %723 = shalt.err (!%p720_p13)
}
  0x86   : > { %s724_s10 = scalar_lea.hbm %s1040_s8, 128  ;;  %s728_s26 = scalar_lea.hbm %s1092_s3, 256 }
  0x87   : > { %p725_p9 = scmp.ne.s32.totalorder %s1040_s8, %s724_s10  ;;  %p729_p5 = scmp.lt.u32.totalorder %s1040_s8, %s1092_s3 }
  0x88   : > { %p730_p2 = scmp.lt.u32.totalorder %s728_s26, %s724_s10  ;;  %p732_p0 = scmp.lt.u32.totalorder %s724_s10, %s1040_s8 }
  0x89   : > { %p726_p7 = pnand %p725_p9, %p1111_p6 }
  0x8a   : > { %p731_p1 = por %p730_p2, %p729_p5 }
  0x8b   : > { %p727_p3 = pneg %p726_p7 }
  0x8c   : > { %p733_p12 = por %p732_p0, %p731_p1 }
  0x8e   : > { %p734_p8 = pnand %p733_p12, %p727_p3 }
  0x90   : > { %737 = shalt.err (!%p734_p8)
}
  0x91   : > { %551 = dma.vmem_to_hbm [thread:$0]  (%p1111_p6), %s1042_s16, 128, %s1040_s8, %s379_s11  }
  0x92 PF: > { %s406_s1 = sand.u32 1, %s776_s12   ;;  %p1112_p11 = scmp.ne.s32.totalorder %s1104_s27, 0 }
  0x93   : > { %p1113_p4 = scmp.ge.s32.totalorder %s796_s17, 2  ;;  %s407_s4 = scalar_lea.sflag [#allocation4], %s406_s1 }
  0x95   : > { %p564_p10 = pnand %p1113_p4, %p1112_p11 }
  0x97   : > { %771 = dma.done.wait (!%p564_p10), %s407_s4, 128  }
  0x98   : > { %773 = vsyncadd (!%p564_p10), %s407_s4, 4294967168  ;;  %s22_s17 = sadd.s32 1, %s796_s17   ;;  %s1114_s25 = sld [smem:[#allocation14_spill]] }
  0x99   : > { %p19_p13 = scmp.ge.s32.totalorder %s22_s17, 4   ;;  %s1115_s15 = sld [smem:[#allocation12_spill]] }
  0x9a   : > { %s1116_s16 = sld [smem:[#allocation13_spill]]  ;;  %s1117_s12 = smov %s780_s13 }
  0x9b   : > { %s1118_s13 = smov %s784_s14  ;;  %21 = sbr.rel (!%p19_p13) target bundleno = 10 (0xa), region = 113 }
  0x9e   : > { %s1119_s14 = smov %s1114_s25 }
  0xa2   :  { %412 = vsyncpa [#allocation3], 1 }
  0xa3   :  { %414 = vsyncpa [#allocation3 + $0x1], 1 }
  0xa4   :  { %415 = vsyncpa [#allocation6], 1 }
  0xa5   :  { %417 = vsyncpa [#allocation6 + $0x1], 1 }
  0xa6   :  { %418 = vsyncpa [#allocation4], 1 }
  0xa7   :  { %420 = vsyncpa [#allocation4 + $0x1], 1 }

</bundles_post_ra>
